<compile_context>
chip_gen: v7x
topology: tpu7x:2x2x1
jax: 0.10.0
libtpu: 0.0.40
codegen_flags: <defaults>
</compile_context>

<pallas_src>
import jax
import jax.numpy as jnp
from jax.experimental import pallas as pl
from jax.experimental.pallas import tpu as pltpu


def _mlp_kernel(x_ref, w1_ref, b1_ref, w2_ref, b2_ref, o_ref):
    # hidden = relu(x @ W1 + b1)   — matmul on the MXU, bias add + relu on the VPU.
    h = jnp.maximum(
        jnp.dot(x_ref[...], w1_ref[...], preferred_element_type=jnp.float32)
        + b1_ref[...],
        0.0,
    )
    # out = hidden @ W2 + b2       — second MXU pass, broadcast bias add.
    o_ref[...] = (
        jnp.dot(h, w2_ref[...], preferred_element_type=jnp.float32) + b2_ref[...]
    ).astype(o_ref.dtype)


def _net_forward_impl(x, w1, b1, w2, b2):
    B, F = x.shape
    H = w1.shape[1]
    O = w2.shape[1]
    b1 = jnp.reshape(b1, (1, H)).astype(jnp.float32)
    b2 = jnp.reshape(b2, (1, O)).astype(jnp.float32)

    # Gridless call: the whole problem fits in VMEM as single blocks — no grid
    # machinery, no per-step pipeline overhead, no wrapper-side layout prep.
    return pl.pallas_call(
        _mlp_kernel,
        out_shape=jax.ShapeDtypeStruct((B, O), jnp.float32),
        in_specs=[
            pl.BlockSpec(memory_space=pltpu.MemorySpace.VMEM),  # x
            pl.BlockSpec(memory_space=pltpu.MemorySpace.VMEM),  # w1
            pl.BlockSpec(memory_space=pltpu.MemorySpace.VMEM),  # b1
            pl.BlockSpec(memory_space=pltpu.MemorySpace.VMEM),  # w2
            pl.BlockSpec(memory_space=pltpu.MemorySpace.VMEM),  # b2
        ],
        out_specs=pl.BlockSpec(memory_space=pltpu.MemorySpace.VMEM),
    )(x.astype(jnp.float32), w1.astype(jnp.float32), b1,
      w2.astype(jnp.float32), b2)


net_forward = jax.jit(_net_forward_impl)


def init_params(key, n_feature, n_hidden, n_output):
    """Deterministic init mimicking torch.nn.Linear's U(-1/sqrt(fan_in), +1/sqrt(fan_in))."""
    k1, k2, k3, k4 = jax.random.split(key, 4)
    lim1 = 1.0 / jnp.sqrt(jnp.float32(n_feature))
    lim2 = 1.0 / jnp.sqrt(jnp.float32(n_hidden))
    w1 = jax.random.uniform(k1, (n_feature, n_hidden), jnp.float32, -lim1, lim1)
    b1 = jax.random.uniform(k2, (1, n_hidden), jnp.float32, -lim1, lim1)
    w2 = jax.random.uniform(k3, (n_hidden, n_output), jnp.float32, -lim2, lim2)
    b2 = jax.random.uniform(k4, (1, n_output), jnp.float32, -lim2, lim2)
    return w1, b1, w2, b2


if __name__ == "__main__":
    # Net(n_feature=2, n_hidden=32, n_output=2); the original script's dataset:
    # 100 samples around +2 and 100 around -2 — processed in ONE batched call.
    n_per_cluster, n_feature, n_hidden, n_output = 100, 2, 32, 2
    B = 2 * n_per_cluster

    key = jax.random.PRNGKey(0)
    kx, kp = jax.random.split(key)
    x0 = 2.0 + jax.random.normal(kx, (n_per_cluster, n_feature), jnp.float32)
    x1 = -2.0 + jax.random.normal(jax.random.fold_in(kx, 1),
                                  (n_per_cluster, n_feature), jnp.float32)
    x = jnp.concatenate([x0, x1], axis=0).astype(jnp.float32)

    w1, b1, w2, b2 = init_params(kp, n_feature, n_hidden, n_output)

    out = net_forward(x, w1, b1, w2, b2)
    out = jax.block_until_ready(out)

    # Reference check in plain JAX (same math as the PyTorch forward).
    ref = jnp.maximum(x @ w1 + b1, 0.0) @ w2 + b2
    assert out.shape == (B, n_output)
    assert jnp.allclose(out, ref, atol=1e-4, rtol=1e-4)

    print("KERNEL_OK")
</pallas_src>

<mosaic_0001>
module attributes {stable_mosaic.version = 11 : i64} {
  func.func @_mlp_kernel(%arg0: memref<200x2xf32, #tpu.memory_space<vmem>>, %arg1: memref<2x32xf32, #tpu.memory_space<vmem>>, %arg2: memref<1x32xf32, #tpu.memory_space<vmem>>, %arg3: memref<32x2xf32, #tpu.memory_space<vmem>>, %arg4: memref<1x2xf32, #tpu.memory_space<vmem>>, %arg5: memref<200x2xf32, #tpu.memory_space<vmem>>) attributes {dimension_semantics = [], scalar_prefetch = 0 : i64, scratch_operands = 0 : i64, tpu.core_type = #tpu.core_type<tc>} {
    %c0 = arith.constant 0 : index
    %c0_0 = arith.constant 0 : index
    %0 = vector.load %arg0[%c0, %c0_0] : memref<200x2xf32, #tpu.memory_space<vmem>>, vector<200x2xf32>
    %c0_1 = arith.constant 0 : index
    %c0_2 = arith.constant 0 : index
    %1 = vector.load %arg1[%c0_1, %c0_2] : memref<2x32xf32, #tpu.memory_space<vmem>>, vector<2x32xf32>
    %cst = arith.constant dense<0.000000e+00> : vector<200x32xf32>
    %2 = tpu.matmul %0, %1, %cst {dimension_numbers = #tpu.dot_dimension_numbers<[1], [0], [0], [1], [0, 0, 1, 1], [], []>} : vector<200x2xf32>, vector<2x32xf32>, vector<200x32xf32> -> vector<200x32xf32>
    %c0_3 = arith.constant 0 : index
    %c0_4 = arith.constant 0 : index
    %3 = vector.load %arg2[%c0_3, %c0_4] : memref<1x32xf32, #tpu.memory_space<vmem>>, vector<1x32xf32>
    %4 = vector.broadcast %3 : vector<1x32xf32> to vector<200x32xf32>
    %5 = arith.addf %2, %4 : vector<200x32xf32>
    %cst_5 = arith.constant 0.000000e+00 : f32
    %6 = vector.broadcast %cst_5 : f32 to vector<200x32xf32>
    %7 = arith.maximumf %5, %6 : vector<200x32xf32>
    %c0_6 = arith.constant 0 : index
    %c0_7 = arith.constant 0 : index
    %8 = vector.load %arg3[%c0_6, %c0_7] : memref<32x2xf32, #tpu.memory_space<vmem>>, vector<32x2xf32>
    %cst_8 = arith.constant dense<0.000000e+00> : vector<200x2xf32>
    %9 = tpu.matmul %7, %8, %cst_8 {dimension_numbers = #tpu.dot_dimension_numbers<[1], [0], [0], [1], [0, 0, 1, 1], [], []>} : vector<200x32xf32>, vector<32x2xf32>, vector<200x2xf32> -> vector<200x2xf32>
    %c0_9 = arith.constant 0 : index
    %c0_10 = arith.constant 0 : index
    %10 = vector.load %arg4[%c0_9, %c0_10] : memref<1x2xf32, #tpu.memory_space<vmem>>, vector<1x2xf32>
    %11 = vector.broadcast %10 : vector<1x2xf32> to vector<200x2xf32>
    %12 = arith.addf %9, %11 : vector<200x2xf32>
    %c0_11 = arith.constant 0 : index
    %c0_12 = arith.constant 0 : index
    %13 = vector.load %arg5[%c0_11, %c0_12] : memref<200x2xf32, #tpu.memory_space<vmem>>, vector<200x2xf32>
    tpu.vector_store %arg5[%c0_11, %c0_12], %12 {strides = array<i32>} : memref<200x2xf32, #tpu.memory_space<vmem>>, vector<200x2xf32>,
    return
  }
}

</mosaic_0001>

<bundles_post_ra>
// kernel: _net_forward_impl.1
= control target key start
LH: loop header
LB: loop body
LE: loop exit
PB: predicated region body
PF: predicated region fallthrough
CT: control target
= control target key end

     0   :  { %vm129_vm0 = vcmask 1041408   ;;  %vm53_vm1 = vcmask 15360   ;;  %v931_v0 = vmov 0.0   ;;  %vm932_vm2 = vmmov 0   ;;  %s1365_s1 = inlined_call_operand.vmem [shape: f32[2,32], index: 1, kind: input, shape index: {}]   ;;  %s1366_s0 = inlined_call_operand.vmem [shape: f32[200,2], index: 0, kind: input, shape index: {}]   ;;  %s1367_s3 = inlined_call_operand.vmem [shape: f32[32,2], index: 3, kind: input, shape index: {}]   ;;  %s1368_s2 = inlined_call_operand.vmem [shape: f32[1,32], index: 2, kind: input, shape index: {}]   ;;  %s1369_s4 = inlined_call_operand.vmem [shape: f32[1,2], index: 4, kind: input, shape index: {}]   ;;  %s1370_s5 = inlined_call_operand.vmem [shape: f32[200,2], index: 5, kind: output, shape index: {}]  }
   0x1   :  { %762 = vmatprep.subr.mxu0 %v931_v0  ;;  %v45_v1 = vld [vmem:[%s1365_s1] sm:$0x3]  ;;  %764 = vmatprep.mubr.msk.f32.mxu0 %vm932_vm2, %v931_v0  ;;  %v933_v3 = vmov 0.0|0.0   ;;  %v21_v4 = vld [vmem:[%s1366_s0 + $0x8] sm:$0xff]  ;;  %v22_v5 = vld [vmem:[%s1366_s0 + $0x10] sm:$0xff]  ;;  %vm359_vm3 = vcmask 261120  }
   0x2   :  { %v20_v2 = vld [vmem:[%s1366_s0] sm:$0xff]  ;;  %763 = vmatpush3.msk.msra.mxu0 %vm129_vm0, %v45_v1  ;;  %922 = vmatprep.subr.bf16.mxu1 %v933_v3  ;;  %v349_v7 = vld [vmem:[%s1367_s3 + $0x8] sm:$0xff]  ;;  %v23_v9 = vld [vmem:[%s1366_s0 + $0x18] sm:$0xff] }
   0x3   :  { %765 = vmatmul.mubr.msk.f32.vlgmr.msra.gmra.mrb[0].mxu0 %vm53_vm1, %v20_v2  ;;  %847 = vmatprep.mubr.msk.f32.mxu1 %vm932_vm2, %v931_v0  ;;  %v348_v6 = vld [vmem:[%s1367_s3] sm:$0xff]  ;;  %v25_v11 = vld [vmem:[%s1366_s0 + $0x28] sm:$0xff]  ;;  %v26_v12 = vld [vmem:[%s1366_s0 + $0x30] sm:$0xff] }
   0x4   :  { %767 = vmatprep.mubr.msk.f32.mxu0 %vm932_vm2, %v931_v0  ;;  %v923_v8 = vpack.c.bf16 %v349_v7, %v348_v6  ;;  %v24_v10 = vld [vmem:[%s1366_s0 + $0x20] sm:$0xff]  ;;  %v27_v13 = vld [vmem:[%s1366_s0 + $0x38] sm:$0xff]  ;;  %v29_v15 = vld [vmem:[%s1366_s0 + $0x48] sm:$0xff] }
   0x5   :  { %v28_v14 = vld [vmem:[%s1366_s0 + $0x40] sm:$0xff]  ;;  %v30_v16 = vld [vmem:[%s1366_s0 + $0x50] sm:$0xff]  ;;  %v31_v17 = vld [vmem:[%s1366_s0 + $0x58] sm:$0xff] }
   0x6   :  { %924 = vmatpush3.bf16.msra.mxu1 %v923_v8  ;;  %v32_v18 = vld [vmem:[%s1366_s0 + $0x60] sm:$0xff]  ;;  %v33_v19 = vld [vmem:[%s1366_s0 + $0x68] sm:$0xff]  ;;  %v34_v20 = vld [vmem:[%s1366_s0 + $0x70] sm:$0xff] }
   0x7   :  { %768 = vmatmul.mubr.msk.f32.gmra.mrb[2].mxu0 %vm53_vm1, %v21_v4  ;;  %925 = vmatprep.subr.bf16.mxu1 %v933_v3  ;;  %v35_v21 = vld [vmem:[%s1366_s0 + $0x78] sm:$0xff]  ;;  %v36_v22 = vld [vmem:[%s1366_s0 + $0x80] sm:$0xff]  ;;  %v37_v23 = vld [vmem:[%s1366_s0 + $0x88] sm:$0xff] }
   0x8   :  { %770 = vmatprep.mubr.msk.f32.mxu0 %vm932_vm2, %v931_v0  ;;  %v38_v24 = vld [vmem:[%s1366_s0 + $0x90] sm:$0xff]  ;;  %v39_v25 = vld [vmem:[%s1366_s0 + $0x98] sm:$0xff]  ;;  %v40_v26 = vld [vmem:[%s1366_s0 + $0xa0] sm:$0xff] }
   0x9   :  { %v41_v27 = vld [vmem:[%s1366_s0 + $0xa8] sm:$0xff]  ;;  %v350_v28 = vld [vmem:[%s1367_s3 + $0x10] sm:$0xff]  ;;  %v351_v29 = vld [vmem:[%s1367_s3 + $0x18] sm:$0xff] }
   0xa   :  { %v926_v30 = vpack.c.bf16 %v351_v29, %v350_v28  ;;  %v42_v31 = vld [vmem:[%s1366_s0 + $0xb0] sm:$0xff]  ;;  %v43_v32 = vld [vmem:[%s1366_s0 + $0xb8] sm:$0xff]  ;;  %v44_v33 = vld [vmem:[%s1366_s0 + $0xc0] sm:$0xff] }
   0xb   :  { %771 = vmatmul.mubr.msk.f32.gmra.mrb[4].mxu0 %vm53_vm1, %v22_v5  ;;  %v1135_v34 = vld [vmem:[%s1368_s2] ss:$0 sm:$0xff] }
   0xc   :  { %773 = vmatprep.mubr.msk.f32.mxu0 %vm932_vm2, %v931_v0  ;;  %927 = vmatpush3.bf16.msra.mxu1 %v926_v30 }
   0xf   :  { %774 = vmatmul.mubr.msk.f32.gmra.mrb[6].mxu0 %vm53_vm1, %v23_v9 }
  0x10   :  { %776 = vmatprep.mubr.msk.f32.mxu0 %vm932_vm2, %v931_v0 }
  0x13   :  { %777 = vmatmul.mubr.msk.f32.gmra.mrb[8].mxu0 %vm53_vm1, %v24_v10 }
  0x14   :  { %779 = vmatprep.mubr.msk.f32.mxu0 %vm932_vm2, %v931_v0 }
  0x17   :  { %780 = vmatmul.mubr.msk.f32.gmra.mrb[10].mxu0 %vm53_vm1, %v25_v11 }
  0x18   :  { %782 = vmatprep.mubr.msk.f32.mxu0 %vm932_vm2, %v931_v0 }
  0x1b   :  { %783 = vmatmul.mubr.msk.f32.gmra.mrb[12].mxu0 %vm53_vm1, %v26_v12 }
  0x1c   :  { %785 = vmatprep.mubr.msk.f32.mxu0 %vm932_vm2, %v931_v0 }
  0x1f   :  { %786 = vmatmul.mubr.msk.f32.gmra.mrb[14].mxu0 %vm53_vm1, %v27_v13 }
  0x20   :  { %788 = vmatprep.mubr.msk.f32.mxu0 %vm932_vm2, %v931_v0 }
  0x23   :  { %789 = vmatmul.mubr.msk.f32.gmra.mrb[16].mxu0 %vm53_vm1, %v28_v14 }
  0x24   :  { %791 = vmatprep.mubr.msk.f32.mxu0 %vm932_vm2, %v931_v0 }
  0x27   :  { %792 = vmatmul.mubr.msk.f32.gmra.mrb[18].mxu0 %vm53_vm1, %v29_v15 }
  0x28   :  { %794 = vmatprep.mubr.msk.f32.mxu0 %vm932_vm2, %v931_v0 }
  0x2b   :  { %795 = vmatmul.mubr.msk.f32.gmra.mrb[20].mxu0 %vm53_vm1, %v30_v16 }
  0x2c   :  { %797 = vmatprep.mubr.msk.f32.mxu0 %vm932_vm2, %v931_v0 }
  0x2f   :  { %798 = vmatmul.mubr.msk.f32.gmra.mrb[22].mxu0 %vm53_vm1, %v31_v17 }
  0x30   :  { %800 = vmatprep.mubr.msk.f32.mxu0 %vm932_vm2, %v931_v0 }
  0x33   :  { %801 = vmatmul.mubr.msk.f32.gmra.mrb[24].mxu0 %vm53_vm1, %v32_v18 }
  0x34   :  { %803 = vmatprep.mubr.msk.f32.mxu0 %vm932_vm2, %v931_v0 }
  0x37   :  { %804 = vmatmul.mubr.msk.f32.gmra.mrb[26].mxu0 %vm53_vm1, %v33_v19 }
  0x38   :  { %806 = vmatprep.mubr.msk.f32.mxu0 %vm932_vm2, %v931_v0 }
  0x3b   :  { %807 = vmatmul.mubr.msk.f32.gmra.mrb[28].mxu0 %vm53_vm1, %v34_v20 }
  0x3c   :  { %809 = vmatprep.mubr.msk.f32.mxu0 %vm932_vm2, %v931_v0 }
  0x3f   :  { %810 = vmatmul.mubr.msk.f32.gmra.mrb[30].mxu0 %vm53_vm1, %v35_v21 }
  0x40   :  { %812 = vmatprep.mubr.msk.f32.mxu0 %vm932_vm2, %v931_v0 }
  0x43   :  { %813 = vmatmul.mubr.msk.f32.gmra.mrb[32].mxu0 %vm53_vm1, %v36_v22 }
  0x44   :  { %815 = vmatprep.mubr.msk.f32.mxu0 %vm932_vm2, %v931_v0 }
  0x47   :  { %816 = vmatmul.mubr.msk.f32.gmra.mrb[34].mxu0 %vm53_vm1, %v37_v23 }
  0x48   :  { %818 = vmatprep.mubr.msk.f32.mxu0 %vm932_vm2, %v931_v0 }
  0x4b   :  { %819 = vmatmul.mubr.msk.f32.gmra.mrb[36].mxu0 %vm53_vm1, %v38_v24 }
  0x4c   :  { %821 = vmatprep.mubr.msk.f32.mxu0 %vm932_vm2, %v931_v0 }
  0x4f   :  { %822 = vmatmul.mubr.msk.f32.gmra.mrb[38].mxu0 %vm53_vm1, %v39_v25 }
  0x50   :  { %824 = vmatprep.mubr.msk.f32.mxu0 %vm932_vm2, %v931_v0 }
  0x53   :  { %825 = vmatmul.mubr.msk.f32.gmra.mrb[40].mxu0 %vm53_vm1, %v40_v26 }
  0x54   :  { %827 = vmatprep.mubr.msk.f32.mxu0 %vm932_vm2, %v931_v0 }
  0x57   :  { %828 = vmatmul.mubr.msk.f32.gmra.mrb[42].mxu0 %vm53_vm1, %v41_v27 }
  0x58   :  { %830 = vmatprep.mubr.msk.f32.mxu0 %vm932_vm2, %v931_v0 }
  0x5b   :  { %831 = vmatmul.mubr.msk.f32.gmra.mrb[44].mxu0 %vm53_vm1, %v42_v31 }
  0x5c   :  { %833 = vmatprep.mubr.msk.f32.mxu0 %vm932_vm2, %v931_v0 }
  0x5f   :  { %834 = vmatmul.mubr.msk.f32.gmra.mrb[46].mxu0 %vm53_vm1, %v43_v32 }
  0x60   :  { %836 = vmatprep.mubr.msk.f32.mxu0 %vm932_vm2, %v931_v0 }
  0x63   :  { %837 = vmatmul.mubr.msk.f32.gmra.mrb[48].mxu0 %vm53_vm1, %v44_v33 }
  0xd6   :  { %v199_v35 = vpop.f32.mrb[0].mxu0 }
  0xd7   :  { %v200_v36 = vadd.f32 %v1135_v34, %v199_v35  ;;  %v766_v37 = vpop.f32.mrb[1].mxu0 }
  0xd9   :  { %v323_v38 = vmax.f32 %v200_v36, 0.0 }
  0xda   :  { %v204_v39 = vpop.f32.mrb[2].mxu0 }
  0xdb   :  { %v205_v40 = vadd.f32 %v1135_v34, %v204_v39  ;;  %v769_v41 = vpop.f32.mrb[3].mxu0  ;;  %848 = vmatmul.mubr.msk.f32.vlgmr.msra.gmra.mrb[0].mxu1 %vm359_vm3, %v323_v38 }
  0xdc   :  { %850 = vmatprep.mubr.msk.f32.mxu1 %vm932_vm2, %v931_v0 }
  0xdd   :  { %v324_v42 = vmax.f32 %v205_v40, 0.0 }
  0xde   :  { %v209_v43 = vpop.f32.mrb[4].mxu0 }
  0xdf   :  { %v210_v44 = vadd.f32 %v1135_v34, %v209_v43  ;;  %v772_v45 = vpop.f32.mrb[5].mxu0  ;;  %851 = vmatmul.mubr.msk.f32.gmra.mrb[2].mxu1 %vm359_vm3, %v324_v42 }
  0xe0   :  { %853 = vmatprep.mubr.msk.f32.mxu1 %vm932_vm2, %v931_v0 }
  0xe1   :  { %v325_v46 = vmax.f32 %v210_v44, 0.0 }
  0xe2   :  { %v214_v47 = vpop.f32.mrb[6].mxu0 }
  0xe3   :  { %v215_v48 = vadd.f32 %v1135_v34, %v214_v47  ;;  %v775_v49 = vpop.f32.mrb[7].mxu0  ;;  %854 = vmatmul.mubr.msk.f32.gmra.mrb[4].mxu1 %vm359_vm3, %v325_v46 }
  0xe4   :  { %856 = vmatprep.mubr.msk.f32.mxu1 %vm932_vm2, %v931_v0 }
  0xe5   :  { %v326_v50 = vmax.f32 %v215_v48, 0.0 }
  0xe6   :  { %v219_v51 = vpop.f32.mrb[8].mxu0 }
  0xe7   :  { %v220_v52 = vadd.f32 %v1135_v34, %v219_v51  ;;  %v778_v53 = vpop.f32.mrb[9].mxu0  ;;  %857 = vmatmul.mubr.msk.f32.gmra.mrb[6].mxu1 %vm359_vm3, %v326_v50 }
  0xe8   :  { %859 = vmatprep.mubr.msk.f32.mxu1 %vm932_vm2, %v931_v0 }
  0xe9   :  { %v327_v54 = vmax.f32 %v220_v52, 0.0 }
  0xea   :  { %v224_v55 = vpop.f32.mrb[10].mxu0 }
  0xeb   :  { %v225_v56 = vadd.f32 %v1135_v34, %v224_v55  ;;  %v781_v57 = vpop.f32.mrb[11].mxu0  ;;  %860 = vmatmul.mubr.msk.f32.gmra.mrb[8].mxu1 %vm359_vm3, %v327_v54 }
  0xec   :  { %862 = vmatprep.mubr.msk.f32.mxu1 %vm932_vm2, %v931_v0 }
  0xed   :  { %v328_v58 = vmax.f32 %v225_v56, 0.0 }
  0xee   :  { %v229_v59 = vpop.f32.mrb[12].mxu0 }
  0xef   :  { %v230_v60 = vadd.f32 %v1135_v34, %v229_v59  ;;  %v784_v61 = vpop.f32.mrb[13].mxu0  ;;  %863 = vmatmul.mubr.msk.f32.gmra.mrb[10].mxu1 %vm359_vm3, %v328_v58 }
  0xf0   :  { %865 = vmatprep.mubr.msk.f32.mxu1 %vm932_vm2, %v931_v0 }
  0xf1   :  { %v329_v62 = vmax.f32 %v230_v60, 0.0 }
  0xf2   :  { %v234_v63 = vpop.f32.mrb[14].mxu0 }
  0xf3   :  { %v235_v1 = vadd.f32 %v1135_v34, %v234_v63  ;;  %v787_v2 = vpop.f32.mrb[15].mxu0  ;;  %866 = vmatmul.mubr.msk.f32.gmra.mrb[12].mxu1 %vm359_vm3, %v329_v62 }
  0xf4   :  { %868 = vmatprep.mubr.msk.f32.mxu1 %vm932_vm2, %v931_v0 }
  0xf5   :  { %v330_v3 = vmax.f32 %v235_v1, 0.0 }
  0xf6   :  { %v239_v4 = vpop.f32.mrb[16].mxu0 }
  0xf7   :  { %v240_v5 = vadd.f32 %v1135_v34, %v239_v4  ;;  %v790_v6 = vpop.f32.mrb[17].mxu0  ;;  %869 = vmatmul.mubr.msk.f32.gmra.mrb[14].mxu1 %vm359_vm3, %v330_v3 }
  0xf8   :  { %871 = vmatprep.mubr.msk.f32.mxu1 %vm932_vm2, %v931_v0 }
  0xf9   :  { %v331_v7 = vmax.f32 %v240_v5, 0.0 }
  0xfa   :  { %v244_v8 = vpop.f32.mrb[18].mxu0 }
  0xfb   :  { %v245_v9 = vadd.f32 %v1135_v34, %v244_v8  ;;  %v793_v10 = vpop.f32.mrb[19].mxu0  ;;  %872 = vmatmul.mubr.msk.f32.gmra.mrb[16].mxu1 %vm359_vm3, %v331_v7 }
  0xfc   :  { %874 = vmatprep.mubr.msk.f32.mxu1 %vm932_vm2, %v931_v0  ;;  %v1238_v10 = vld [vmem:[%s1369_s4] ss:$0 sm:$0xff] }
  0xfd   :  { %v332_v11 = vmax.f32 %v245_v9, 0.0 }
  0xfe   :  { %v249_v12 = vpop.f32.mrb[20].mxu0 }
  0xff   :  { %v250_v13 = vadd.f32 %v1135_v34, %v249_v12  ;;  %v796_v14 = vpop.f32.mrb[21].mxu0  ;;  %875 = vmatmul.mubr.msk.f32.gmra.mrb[18].mxu1 %vm359_vm3, %v332_v11 }
 0x100   :  { %877 = vmatprep.mubr.msk.f32.mxu1 %vm932_vm2, %v931_v0 }
 0x101   :  { %v333_v15 = vmax.f32 %v250_v13, 0.0 }
 0x102   :  { %v254_v16 = vpop.f32.mrb[22].mxu0 }
 0x103   :  { %v255_v17 = vadd.f32 %v1135_v34, %v254_v16  ;;  %v799_v18 = vpop.f32.mrb[23].mxu0  ;;  %878 = vmatmul.mubr.msk.f32.gmra.mrb[20].mxu1 %vm359_vm3, %v333_v15 }
 0x104   :  { %880 = vmatprep.mubr.msk.f32.mxu1 %vm932_vm2, %v931_v0 }
 0x105   :  { %v334_v19 = vmax.f32 %v255_v17, 0.0 }
 0x106   :  { %v259_v20 = vpop.f32.mrb[24].mxu0 }
 0x107   :  { %v260_v21 = vadd.f32 %v1135_v34, %v259_v20  ;;  %v802_v22 = vpop.f32.mrb[25].mxu0  ;;  %881 = vmatmul.mubr.msk.f32.gmra.mrb[22].mxu1 %vm359_vm3, %v334_v19 }
 0x108   :  { %883 = vmatprep.mubr.msk.f32.mxu1 %vm932_vm2, %v931_v0 }
 0x109   :  { %v335_v23 = vmax.f32 %v260_v21, 0.0 }
 0x10a   :  { %v264_v24 = vpop.f32.mrb[26].mxu0 }
 0x10b   :  { %v265_v25 = vadd.f32 %v1135_v34, %v264_v24  ;;  %v805_v26 = vpop.f32.mrb[27].mxu0  ;;  %884 = vmatmul.mubr.msk.f32.gmra.mrb[24].mxu1 %vm359_vm3, %v335_v23 }
 0x10c   :  { %886 = vmatprep.mubr.msk.f32.mxu1 %vm932_vm2, %v931_v0 }
 0x10d   :  { %v336_v27 = vmax.f32 %v265_v25, 0.0 }
 0x10e   :  { %v269_v28 = vpop.f32.mrb[28].mxu0 }
 0x10f   :  { %v270_v29 = vadd.f32 %v1135_v34, %v269_v28  ;;  %v808_v30 = vpop.f32.mrb[29].mxu0  ;;  %887 = vmatmul.mubr.msk.f32.gmra.mrb[26].mxu1 %vm359_vm3, %v336_v27 }
 0x110   :  { %889 = vmatprep.mubr.msk.f32.mxu1 %vm932_vm2, %v931_v0 }
 0x111   :  { %v337_v31 = vmax.f32 %v270_v29, 0.0 }
 0x112   :  { %v274_v32 = vpop.f32.mrb[30].mxu0 }
 0x113   :  { %v275_v33 = vadd.f32 %v1135_v34, %v274_v32  ;;  %v811_v35 = vpop.f32.mrb[31].mxu0  ;;  %890 = vmatmul.mubr.msk.f32.gmra.mrb[28].mxu1 %vm359_vm3, %v337_v31 }
 0x114   :  { %892 = vmatprep.mubr.msk.f32.mxu1 %vm932_vm2, %v931_v0 }
 0x115   :  { %v338_v36 = vmax.f32 %v275_v33, 0.0 }
 0x116   :  { %v279_v37 = vpop.f32.mrb[32].mxu0 }
 0x117   :  { %v280_v38 = vadd.f32 %v1135_v34, %v279_v37  ;;  %v814_v39 = vpop.f32.mrb[33].mxu0  ;;  %893 = vmatmul.mubr.msk.f32.gmra.mrb[30].mxu1 %vm359_vm3, %v338_v36 }
 0x118   :  { %895 = vmatprep.mubr.msk.f32.mxu1 %vm932_vm2, %v931_v0 }
 0x119   :  { %v339_v40 = vmax.f32 %v280_v38, 0.0 }
 0x11a   :  { %v284_v41 = vpop.f32.mrb[34].mxu0 }
 0x11b   :  { %v285_v42 = vadd.f32 %v1135_v34, %v284_v41  ;;  %v817_v43 = vpop.f32.mrb[35].mxu0  ;;  %896 = vmatmul.mubr.msk.f32.gmra.mrb[32].mxu1 %vm359_vm3, %v339_v40 }
 0x11c   :  { %898 = vmatprep.mubr.msk.f32.mxu1 %vm932_vm2, %v931_v0 }
 0x11d   :  { %v340_v44 = vmax.f32 %v285_v42, 0.0 }
 0x11e   :  { %v289_v45 = vpop.f32.mrb[36].mxu0 }
 0x11f   :  { %v290_v46 = vadd.f32 %v1135_v34, %v289_v45  ;;  %v820_v47 = vpop.f32.mrb[37].mxu0  ;;  %899 = vmatmul.mubr.msk.f32.gmra.mrb[34].mxu1 %vm359_vm3, %v340_v44 }
 0x120   :  { %901 = vmatprep.mubr.msk.f32.mxu1 %vm932_vm2, %v931_v0 }
 0x121   :  { %v341_v48 = vmax.f32 %v290_v46, 0.0 }
 0x122   :  { %v294_v49 = vpop.f32.mrb[38].mxu0 }
 0x123   :  { %v295_v50 = vadd.f32 %v1135_v34, %v294_v49  ;;  %v823_v51 = vpop.f32.mrb[39].mxu0  ;;  %902 = vmatmul.mubr.msk.f32.gmra.mrb[36].mxu1 %vm359_vm3, %v341_v48 }
 0x124   :  { %904 = vmatprep.mubr.msk.f32.mxu1 %vm932_vm2, %v931_v0 }
 0x125   :  { %v342_v52 = vmax.f32 %v295_v50, 0.0 }
 0x126   :  { %v299_v53 = vpop.f32.mrb[40].mxu0 }
 0x127   :  { %v300_v54 = vadd.f32 %v1135_v34, %v299_v53  ;;  %v826_v55 = vpop.f32.mrb[41].mxu0  ;;  %905 = vmatmul.mubr.msk.f32.gmra.mrb[38].mxu1 %vm359_vm3, %v342_v52 }
 0x128   :  { %907 = vmatprep.mubr.msk.f32.mxu1 %vm932_vm2, %v931_v0 }
 0x129   :  { %v343_v56 = vmax.f32 %v300_v54, 0.0 }
 0x12a   :  { %v304_v57 = vpop.f32.mrb[42].mxu0 }
 0x12b   :  { %v305_v58 = vadd.f32 %v1135_v34, %v304_v57  ;;  %v829_v59 = vpop.f32.mrb[43].mxu0  ;;  %908 = vmatmul.mubr.msk.f32.gmra.mrb[40].mxu1 %vm359_vm3, %v343_v56 }
 0x12c   :  { %910 = vmatprep.mubr.msk.f32.mxu1 %vm932_vm2, %v931_v0 }
 0x12d   :  { %v344_v60 = vmax.f32 %v305_v58, 0.0 }
 0x12e   :  { %v309_v61 = vpop.f32.mrb[44].mxu0 }
 0x12f   :  { %v310_v62 = vadd.f32 %v1135_v34, %v309_v61  ;;  %v832_v63 = vpop.f32.mrb[45].mxu0  ;;  %911 = vmatmul.mubr.msk.f32.gmra.mrb[42].mxu1 %vm359_vm3, %v344_v60 }
 0x130   :  { %913 = vmatprep.mubr.msk.f32.mxu1 %vm932_vm2, %v931_v0 }
 0x131   :  { %v345_v1 = vmax.f32 %v310_v62, 0.0 }
 0x132   :  { %v314_v2 = vpop.f32.mrb[46].mxu0 }
 0x133   :  { %v315_v3 = vadd.f32 %v1135_v34, %v314_v2  ;;  %v835_v4 = vpop.f32.mrb[47].mxu0  ;;  %914 = vmatmul.mubr.msk.f32.gmra.mrb[44].mxu1 %vm359_vm3, %v345_v1 }
 0x134   :  { %916 = vmatprep.mubr.msk.f32.mxu1 %vm932_vm2, %v931_v0 }
 0x135   :  { %v346_v5 = vmax.f32 %v315_v3, 0.0 }
 0x136   :  { %v319_v6 = vpop.f32.mrb[48].mxu0 }
 0x137   :  { %v320_v7 = vadd.f32 %v1135_v34, %v319_v6  ;;  %v838_v8 = vpop.f32.mrb[49].mxu0  ;;  %917 = vmatmul.mubr.msk.f32.gmra.mrb[46].mxu1 %vm359_vm3, %v346_v5 }
 0x138   :  { %919 = vmatprep.mubr.msk.f32.mxu1 %vm932_vm2, %v931_v0 }
 0x139   :  { %v347_v9 = vmax.f32 %v320_v7, 0.0 }
 0x13b   :  { %920 = vmatmul.mubr.msk.f32.gmra.mrb[48].mxu1 %vm359_vm3, %v347_v9 }
 0x1ae   :  { %v501_v11 = vpop.f32.mrb[0].mxu1 }
 0x1af   :  { %v502_v12 = vadd.f32 %v1238_v10, %v501_v11  ;;  %v849_v13 = vpop.f32.mrb[1].mxu1 }
 0x1b1   :  { %625 = vst.msk [vmem:[%s1370_s5] sm:$0xff] %vm53_vm1, %v502_v12 }
 0x1b2   :  { %v506_v34 = vpop.f32.mrb[2].mxu1 }
 0x1b3   :  { %v507_v0 = vadd.f32 %v1238_v10, %v506_v34  ;;  %v852_v14 = vpop.f32.mrb[3].mxu1 }
 0x1b5   :  { %626 = vst.msk [vmem:[%s1370_s5 + $0x8] sm:$0xff] %vm53_vm1, %v507_v0 }
 0x1b6   :  { %v511_v15 = vpop.f32.mrb[4].mxu1 }
 0x1b7   :  { %v512_v16 = vadd.f32 %v1238_v10, %v511_v15  ;;  %v855_v17 = vpop.f32.mrb[5].mxu1 }
 0x1b9   :  { %627 = vst.msk [vmem:[%s1370_s5 + $0x10] sm:$0xff] %vm53_vm1, %v512_v16 }
 0x1ba   :  { %v516_v18 = vpop.f32.mrb[6].mxu1 }
 0x1bb   :  { %v517_v19 = vadd.f32 %v1238_v10, %v516_v18  ;;  %v858_v20 = vpop.f32.mrb[7].mxu1 }
 0x1bd   :  { %628 = vst.msk [vmem:[%s1370_s5 + $0x18] sm:$0xff] %vm53_vm1, %v517_v19 }
 0x1be   :  { %v521_v21 = vpop.f32.mrb[8].mxu1 }
 0x1bf   :  { %v522_v22 = vadd.f32 %v1238_v10, %v521_v21  ;;  %v861_v23 = vpop.f32.mrb[9].mxu1 }
 0x1c1   :  { %629 = vst.msk [vmem:[%s1370_s5 + $0x20] sm:$0xff] %vm53_vm1, %v522_v22 }
 0x1c2   :  { %v526_v24 = vpop.f32.mrb[10].mxu1 }
 0x1c3   :  { %v527_v25 = vadd.f32 %v1238_v10, %v526_v24  ;;  %v864_v26 = vpop.f32.mrb[11].mxu1 }
 0x1c5   :  { %630 = vst.msk [vmem:[%s1370_s5 + $0x28] sm:$0xff] %vm53_vm1, %v527_v25 }
 0x1c6   :  { %v531_v27 = vpop.f32.mrb[12].mxu1 }
 0x1c7   :  { %v532_v28 = vadd.f32 %v1238_v10, %v531_v27  ;;  %v867_v29 = vpop.f32.mrb[13].mxu1 }
 0x1c9   :  { %631 = vst.msk [vmem:[%s1370_s5 + $0x30] sm:$0xff] %vm53_vm1, %v532_v28 }
 0x1ca   :  { %v536_v30 = vpop.f32.mrb[14].mxu1 }
 0x1cb   :  { %v537_v31 = vadd.f32 %v1238_v10, %v536_v30  ;;  %v870_v32 = vpop.f32.mrb[15].mxu1 }
 0x1cd   :  { %632 = vst.msk [vmem:[%s1370_s5 + $0x38] sm:$0xff] %vm53_vm1, %v537_v31 }
 0x1ce   :  { %v541_v33 = vpop.f32.mrb[16].mxu1 }
 0x1cf   :  { %v542_v35 = vadd.f32 %v1238_v10, %v541_v33  ;;  %v873_v36 = vpop.f32.mrb[17].mxu1 }
 0x1d1   :  { %633 = vst.msk [vmem:[%s1370_s5 + $0x40] sm:$0xff] %vm53_vm1, %v542_v35 }
 0x1d2   :  { %v546_v37 = vpop.f32.mrb[18].mxu1 }
 0x1d3   :  { %v547_v38 = vadd.f32 %v1238_v10, %v546_v37  ;;  %v876_v39 = vpop.f32.mrb[19].mxu1 }
 0x1d5   :  { %634 = vst.msk [vmem:[%s1370_s5 + $0x48] sm:$0xff] %vm53_vm1, %v547_v38 }
 0x1d6   :  { %v551_v40 = vpop.f32.mrb[20].mxu1 }
 0x1d7   :  { %v552_v41 = vadd.f32 %v1238_v10, %v551_v40  ;;  %v879_v42 = vpop.f32.mrb[21].mxu1 }
 0x1d9   :  { %635 = vst.msk [vmem:[%s1370_s5 + $0x50] sm:$0xff] %vm53_vm1, %v552_v41 }
 0x1da   :  { %v556_v43 = vpop.f32.mrb[22].mxu1 }
 0x1db   :  { %v557_v44 = vadd.f32 %v1238_v10, %v556_v43  ;;  %v882_v45 = vpop.f32.mrb[23].mxu1 }
 0x1dd   :  { %636 = vst.msk [vmem:[%s1370_s5 + $0x58] sm:$0xff] %vm53_vm1, %v557_v44 }
 0x1de   :  { %v561_v46 = vpop.f32.mrb[24].mxu1 }
 0x1df   :  { %v562_v47 = vadd.f32 %v1238_v10, %v561_v46  ;;  %v885_v48 = vpop.f32.mrb[25].mxu1 }
 0x1e1   :  { %637 = vst.msk [vmem:[%s1370_s5 + $0x60] sm:$0xff] %vm53_vm1, %v562_v47 }
 0x1e2   :  { %v566_v49 = vpop.f32.mrb[26].mxu1 }
 0x1e3   :  { %v567_v50 = vadd.f32 %v1238_v10, %v566_v49  ;;  %v888_v51 = vpop.f32.mrb[27].mxu1 }
 0x1e5   :  { %638 = vst.msk [vmem:[%s1370_s5 + $0x68] sm:$0xff] %vm53_vm1, %v567_v50 }
 0x1e6   :  { %v571_v52 = vpop.f32.mrb[28].mxu1 }
 0x1e7   :  { %v572_v53 = vadd.f32 %v1238_v10, %v571_v52  ;;  %v891_v54 = vpop.f32.mrb[29].mxu1 }
 0x1e9   :  { %639 = vst.msk [vmem:[%s1370_s5 + $0x70] sm:$0xff] %vm53_vm1, %v572_v53 }
 0x1ea   :  { %v576_v55 = vpop.f32.mrb[30].mxu1 }
 0x1eb   :  { %v577_v56 = vadd.f32 %v1238_v10, %v576_v55  ;;  %v894_v57 = vpop.f32.mrb[31].mxu1 }
 0x1ed   :  { %640 = vst.msk [vmem:[%s1370_s5 + $0x78] sm:$0xff] %vm53_vm1, %v577_v56 }
 0x1ee   :  { %v581_v58 = vpop.f32.mrb[32].mxu1 }
 0x1ef   :  { %v582_v59 = vadd.f32 %v1238_v10, %v581_v58  ;;  %v897_v60 = vpop.f32.mrb[33].mxu1 }
 0x1f1   :  { %641 = vst.msk [vmem:[%s1370_s5 + $0x80] sm:$0xff] %vm53_vm1, %v582_v59 }
 0x1f2   :  { %v586_v61 = vpop.f32.mrb[34].mxu1 }
 0x1f3   :  { %v587_v62 = vadd.f32 %v1238_v10, %v586_v61  ;;  %v900_v63 = vpop.f32.mrb[35].mxu1 }
 0x1f5   :  { %642 = vst.msk [vmem:[%s1370_s5 + $0x88] sm:$0xff] %vm53_vm1, %v587_v62 }
 0x1f6   :  { %v591_v1 = vpop.f32.mrb[36].mxu1 }
 0x1f7   :  { %v592_v2 = vadd.f32 %v1238_v10, %v591_v1  ;;  %v903_v3 = vpop.f32.mrb[37].mxu1 }
 0x1f9   :  { %643 = vst.msk [vmem:[%s1370_s5 + $0x90] sm:$0xff] %vm53_vm1, %v592_v2 }
 0x1fa   :  { %v596_v4 = vpop.f32.mrb[38].mxu1 }
 0x1fb   :  { %v597_v5 = vadd.f32 %v1238_v10, %v596_v4  ;;  %v906_v6 = vpop.f32.mrb[39].mxu1 }
 0x1fd   :  { %644 = vst.msk [vmem:[%s1370_s5 + $0x98] sm:$0xff] %vm53_vm1, %v597_v5 }
 0x1fe   :  { %v601_v7 = vpop.f32.mrb[40].mxu1 }
 0x1ff   :  { %v602_v8 = vadd.f32 %v1238_v10, %v601_v7  ;;  %v909_v9 = vpop.f32.mrb[41].mxu1 }
 0x201   :  { %645 = vst.msk [vmem:[%s1370_s5 + $0xa0] sm:$0xff] %vm53_vm1, %v602_v8 }
 0x202   :  { %v606_v11 = vpop.f32.mrb[42].mxu1 }
 0x203   :  { %v607_v12 = vadd.f32 %v1238_v10, %v606_v11  ;;  %v912_v13 = vpop.f32.mrb[43].mxu1 }
 0x205   :  { %646 = vst.msk [vmem:[%s1370_s5 + $0xa8] sm:$0xff] %vm53_vm1, %v607_v12 }
 0x206   :  { %v611_v34 = vpop.f32.mrb[44].mxu1 }
 0x207   :  { %v612_v0 = vadd.f32 %v1238_v10, %v611_v34  ;;  %v915_v14 = vpop.f32.mrb[45].mxu1 }
 0x209   :  { %647 = vst.msk [vmem:[%s1370_s5 + $0xb0] sm:$0xff] %vm53_vm1, %v612_v0 }
 0x20a   :  { %v616_v15 = vpop.f32.mrb[46].mxu1 }
 0x20b   :  { %v617_v16 = vadd.f32 %v1238_v10, %v616_v15  ;;  %v918_v17 = vpop.f32.mrb[47].mxu1 }
 0x20d   :  { %648 = vst.msk [vmem:[%s1370_s5 + $0xb8] sm:$0xff] %vm53_vm1, %v617_v16 }
 0x20e   :  { %v621_v18 = vpop.f32.mrb[48].mxu1 }
 0x20f   :  { %v622_v19 = vadd.f32 %v1238_v10, %v621_v18  ;;  %v921_v20 = vpop.f32.mrb[49].mxu1 }
 0x211   :  { %649 = vst.msk [vmem:[%s1370_s5 + $0xc0] sm:$0xff] %vm53_vm1, %v622_v19 }

</bundles_post_ra>
